<compile_context>
chip_gen: v7x
topology: tpu7x:2x2x1
jax: 0.10.0
libtpu: 0.0.40
codegen_flags: <defaults>
</compile_context>

<pallas_src>
import warnings

import jax
import jax.numpy as jnp
from jax.experimental import pallas as pl
from jax.experimental.pallas import tpu as pltpu  # noqa: F401  (TPU backend)

# Non-fatal safety net: if the runtime cannot use the donated buffer it emits a
# UserWarning ("Some donated buffers were not usable"); the kernel is still
# correct in that case, so silence just that message.
warnings.filterwarnings("ignore", message=".*donated buffers were not usable.*")


def _add_add_kernel(x228_ref, x213_ref, x244_ref, out_ref):
    # x229 = x228 + x213 ; x245 = x244 + x229  (same association as PyTorch)
    out_ref[...] = x244_ref[...] + (x228_ref[...] + x213_ref[...])


def _add_add_impl(x228, x213, x244):
    """x244 + (x228 + x213) as a single-block, lane-dense Pallas TPU kernel."""
    assert x228.shape == x213.shape == x244.shape
    assert x228.dtype == x213.dtype == x244.dtype
    orig_shape = x228.shape

    total = 1
    for d in orig_shape:
        total *= d

    # Lane-dense 2-D slab: 8 rows (one full sublane tile) when possible, with
    # the remaining (wide) extent on the lane (last) axis.  Do NOT pad cols to
    # a multiple of 128 -- only the last lane tile is masked (~2.6% waste) and
    # a pad op would add an extra HBM pass.
    rows = 1
    for r in (8, 4, 2):
        if total % r == 0:
            rows = r
            break
    cols = total // rows

    itemsize = jnp.dtype(x244.dtype).itemsize

    # Under jit these reshapes are bitcasts (default row-major layout), not
    # materialized copies.
    x228_2d = x228.reshape(rows, cols)
    x213_2d = x213.reshape(rows, cols)
    x244_2d = x244.reshape(rows, cols)

    full_spec = pl.BlockSpec((rows, cols), lambda: (0, 0))
    out_2d = pl.pallas_call(
        _add_add_kernel,
        out_shape=jax.ShapeDtypeStruct((rows, cols), x244.dtype),
        grid=(),  # single full-array block: per-grid-step overhead would dominate
        in_specs=[full_spec, full_spec, full_spec],
        out_specs=full_spec,
        input_output_aliases={2: 0},  # output reuses x244's buffer (in place)
        cost_estimate=pl.CostEstimate(
            flops=2 * total,                     # two adds per element
            transcendentals=0,
            bytes_accessed=4 * total * itemsize,  # 3 reads + 1 write
        ),
    )(x228_2d, x213_2d, x244_2d)
    return out_2d.reshape(orig_shape)


# x244 (arg index 2) is donated: its buffer is aliased to the output and must
# not be read by the caller after this call.
add_add = jax.jit(_add_add_impl, donate_argnums=2)


if __name__ == "__main__":
    key = jax.random.PRNGKey(0)
    k1, k2, k3 = jax.random.split(key, 3)
    shape = (1, 112, 14, 14)  # matches the module's input shapes
    x213 = jax.random.normal(k1, shape, dtype=jnp.float32)
    x228 = jax.random.normal(k2, shape, dtype=jnp.float32)
    x244 = jax.random.normal(k3, shape, dtype=jnp.float32)

    # Reference computed BEFORE the kernel call: x244 is donated (its buffer is
    # overwritten in place by the aliased output).
    ref = x244 + (x228 + x213)
    jax.block_until_ready(ref)

    out = add_add(x228, x213, x244)
    jax.block_until_ready(out)

    assert out.shape == shape
    assert jnp.allclose(out, ref, atol=1e-6, rtol=1e-6)
    print("KERNEL_OK")
</pallas_src>

<mosaic_0001>
module attributes {stable_mosaic.version = 11 : i64} {
  func.func @_add_add_kernel(%arg0: memref<8x2744xf32, #tpu.memory_space<vmem>>, %arg1: memref<8x2744xf32, #tpu.memory_space<vmem>>, %arg2: memref<8x2744xf32, #tpu.memory_space<vmem>>, %arg3: memref<8x2744xf32, #tpu.memory_space<vmem>>) attributes {dimension_semantics = [], scalar_prefetch = 0 : i64, scratch_operands = 0 : i64, tpu.core_type = #tpu.core_type<tc>} {
    %c0 = arith.constant 0 : index
    %c0_0 = arith.constant 0 : index
    %0 = vector.load %arg2[%c0, %c0_0] : memref<8x2744xf32, #tpu.memory_space<vmem>>, vector<8x2744xf32>
    %c0_1 = arith.constant 0 : index
    %c0_2 = arith.constant 0 : index
    %1 = vector.load %arg0[%c0_1, %c0_2] : memref<8x2744xf32, #tpu.memory_space<vmem>>, vector<8x2744xf32>
    %c0_3 = arith.constant 0 : index
    %c0_4 = arith.constant 0 : index
    %2 = vector.load %arg1[%c0_3, %c0_4] : memref<8x2744xf32, #tpu.memory_space<vmem>>, vector<8x2744xf32>
    %3 = arith.addf %1, %2 : vector<8x2744xf32>
    %4 = arith.addf %0, %3 : vector<8x2744xf32>
    %c0_5 = arith.constant 0 : index
    %c0_6 = arith.constant 0 : index
    %5 = vector.load %arg3[%c0_5, %c0_6] : memref<8x2744xf32, #tpu.memory_space<vmem>>, vector<8x2744xf32>
    tpu.vector_store %arg3[%c0_5, %c0_6], %4 {strides = array<i32>} : memref<8x2744xf32, #tpu.memory_space<vmem>>, vector<8x2744xf32>,
    return
  }
}

</mosaic_0001>

<bundles_post_ra>
// kernel: _add_add_impl.1
= control target key start
LH: loop header
LB: loop body
LE: loop exit
PB: predicated region body
PF: predicated region fallthrough
CT: control target
= control target key end

     0   :  { %vm145_vm0 = vcmask 457728   ;;  %s435_s0 = inlined_call_operand.vmem [shape: f32[8,2744], index: 0, kind: input, shape index: {}]   ;;  %s436_s1 = inlined_call_operand.vmem [shape: f32[8,2744], index: 1, kind: input, shape index: {}]   ;;  %s437_s2 = inlined_call_operand.vmem [shape: f32[8,2744], index: 2, kind: input, shape index: {}, may-alias: {2,3}]   ;;  %s438_s3 = inlined_call_operand.vmem [shape: f32[8,2744], index: 3, kind: output, shape index: {}, may-alias: {2,3}]  }
   0x1   :  { %v14_v0 = vld [vmem:[%s437_s2] sm:$0xff]  ;;  %v15_v4 = vld [vmem:[%s437_s2 + $0x8] sm:$0xff]  ;;  %v16_v8 = vld [vmem:[%s437_s2 + $0x10] sm:$0xff] }
   0x2   :  { %v36_v1 = vld [vmem:[%s435_s0] sm:$0xff]  ;;  %v37_v5 = vld [vmem:[%s435_s0 + $0x8] sm:$0xff]  ;;  %v38_v9 = vld [vmem:[%s435_s0 + $0x10] sm:$0xff] }
   0x3   :  { %v58_v2 = vld [vmem:[%s436_s1] sm:$0xff]  ;;  %v59_v6 = vld [vmem:[%s436_s1 + $0x8] sm:$0xff]  ;;  %v60_v10 = vld [vmem:[%s436_s1 + $0x10] sm:$0xff] }
   0x4   :  { %v80_v3 = vadd.f32 %v58_v2, %v36_v1  ;;  %v81_v7 = vadd.f32 %v59_v6, %v37_v5  ;;  %v82_v12 = vadd.f32 %v60_v10, %v38_v9  ;;  %v17_v13 = vld [vmem:[%s437_s2 + $0x18] sm:$0xff]  ;;  %v18_v18 = vld [vmem:[%s437_s2 + $0x20] sm:$0xff]  ;;  %v41_v24 = vld [vmem:[%s435_s0 + $0x28] sm:$0xff] }
   0x5   :  { %v39_v14 = vld [vmem:[%s435_s0 + $0x18] sm:$0xff]  ;;  %v40_v19 = vld [vmem:[%s435_s0 + $0x20] sm:$0xff]  ;;  %v63_v25 = vld [vmem:[%s436_s1 + $0x28] sm:$0xff] }
   0x6   :  { %v102_v11 = vadd.f32 %v80_v3, %v14_v0  ;;  %v61_v15 = vld [vmem:[%s436_s1 + $0x18] sm:$0xff]  ;;  %v103_v16 = vadd.f32 %v81_v7, %v15_v4  ;;  %v62_v20 = vld [vmem:[%s436_s1 + $0x20] sm:$0xff]  ;;  %v104_v21 = vadd.f32 %v82_v12, %v16_v8  ;;  %v85_v27 = vadd.f32 %v63_v25, %v41_v24  ;;  %v42_v29 = vld [vmem:[%s435_s0 + $0x30] sm:$0xff] }
   0x7   :  { %v83_v17 = vadd.f32 %v61_v15, %v39_v14  ;;  %v84_v22 = vadd.f32 %v62_v20, %v40_v19  ;;  %v64_v30 = vld [vmem:[%s436_s1 + $0x30] sm:$0xff]  ;;  %v43_v34 = vld [vmem:[%s435_s0 + $0x38] sm:$0xff]  ;;  %v44_v39 = vld [vmem:[%s435_s0 + $0x40] sm:$0xff] }
   0x8   :  { %124 = vst [vmem:[%s438_s3] sm:$0xff] %v102_v11  ;;  %v86_v32 = vadd.f32 %v64_v30, %v42_v29  ;;  %v65_v35 = vld [vmem:[%s436_s1 + $0x38] sm:$0xff]  ;;  %v66_v40 = vld [vmem:[%s436_s1 + $0x40] sm:$0xff]  ;;  %v45_v44 = vld [vmem:[%s435_s0 + $0x48] sm:$0xff] }
   0x9   :  { %v105_v26 = vadd.f32 %v83_v17, %v17_v13  ;;  %v106_v31 = vadd.f32 %v84_v22, %v18_v18  ;;  %v87_v37 = vadd.f32 %v65_v35, %v43_v34  ;;  %v88_v42 = vadd.f32 %v66_v40, %v44_v39  ;;  %v67_v45 = vld [vmem:[%s436_s1 + $0x48] sm:$0xff]  ;;  %v46_v49 = vld [vmem:[%s435_s0 + $0x50] sm:$0xff]  ;;  %v47_v54 = vld [vmem:[%s435_s0 + $0x58] sm:$0xff] }
   0xa   :  { %v89_v47 = vadd.f32 %v67_v45, %v45_v44  ;;  %v68_v50 = vld [vmem:[%s436_s1 + $0x50] sm:$0xff]  ;;  %v69_v55 = vld [vmem:[%s436_s1 + $0x58] sm:$0xff]  ;;  %v48_v59 = vld [vmem:[%s435_s0 + $0x60] sm:$0xff] }
   0xb   :  { %v90_v52 = vadd.f32 %v68_v50, %v46_v49  ;;  %v91_v57 = vadd.f32 %v69_v55, %v47_v54  ;;  %v70_v60 = vld [vmem:[%s436_s1 + $0x60] sm:$0xff]  ;;  %v49_v0 = vld [vmem:[%s435_s0 + $0x68] sm:$0xff]  ;;  %v50_v5 = vld [vmem:[%s435_s0 + $0x70] sm:$0xff] }
   0xc   :  { %v92_v62 = vadd.f32 %v70_v60, %v48_v59  ;;  %v71_v1 = vld [vmem:[%s436_s1 + $0x68] sm:$0xff]  ;;  %v72_v6 = vld [vmem:[%s436_s1 + $0x70] sm:$0xff]  ;;  %v51_v10 = vld [vmem:[%s435_s0 + $0x78] sm:$0xff] }
   0xd   :  { %v93_v3 = vadd.f32 %v71_v1, %v49_v0  ;;  %v94_v8 = vadd.f32 %v72_v6, %v50_v5  ;;  %v73_v11 = vld [vmem:[%s436_s1 + $0x78] sm:$0xff]  ;;  %v52_v15 = vld [vmem:[%s435_s0 + $0x80] sm:$0xff]  ;;  %v53_v20 = vld [vmem:[%s435_s0 + $0x88] sm:$0xff] }
   0xe   :  { %v95_v13 = vadd.f32 %v73_v11, %v51_v10  ;;  %v54_v25 = vld [vmem:[%s435_s0 + $0x90] sm:$0xff]  ;;  %v55_v30 = vld [vmem:[%s435_s0 + $0x98] sm:$0xff]  ;;  %v56_v35 = vld [vmem:[%s435_s0 + $0xa0] sm:$0xff] }
   0xf   :  { %v19_v23 = vld [vmem:[%s437_s2 + $0x28] sm:$0xff] }
  0x10   :  { %125 = vst [vmem:[%s438_s3 + $0x8] sm:$0xff] %v103_v16  ;;  %v107_v36 = vadd.f32 %v85_v27, %v19_v23  ;;  %v74_v16 = vld [vmem:[%s436_s1 + $0x80] sm:$0xff]  ;;  %v57_v40 = vld [vmem:[%s435_s0 + $0xa8] sm:$0xff] }
  0x11   :  { %v96_v18 = vadd.f32 %v74_v16, %v52_v15 }
  0x17   :  { %v20_v28 = vld [vmem:[%s437_s2 + $0x30] sm:$0xff] }
  0x18   :  { %126 = vst [vmem:[%s438_s3 + $0x10] sm:$0xff] %v104_v21  ;;  %v108_v41 = vadd.f32 %v86_v32, %v20_v28  ;;  %v75_v21 = vld [vmem:[%s436_s1 + $0x88] sm:$0xff] }
  0x19   :  { %v97_v23 = vadd.f32 %v75_v21, %v53_v20 }
  0x1f   :  { %v21_v33 = vld [vmem:[%s437_s2 + $0x38] sm:$0xff] }
  0x20   :  { %127 = vst [vmem:[%s438_s3 + $0x18] sm:$0xff] %v105_v26  ;;  %v109_v46 = vadd.f32 %v87_v37, %v21_v33  ;;  %v76_v26 = vld [vmem:[%s436_s1 + $0x90] sm:$0xff] }
  0x21   :  { %v98_v28 = vadd.f32 %v76_v26, %v54_v25 }
  0x27   :  { %v22_v38 = vld [vmem:[%s437_s2 + $0x40] sm:$0xff] }
  0x28   :  { %128 = vst [vmem:[%s438_s3 + $0x20] sm:$0xff] %v106_v31  ;;  %v110_v51 = vadd.f32 %v88_v42, %v22_v38  ;;  %v77_v31 = vld [vmem:[%s436_s1 + $0x98] sm:$0xff] }
  0x29   :  { %v99_v33 = vadd.f32 %v77_v31, %v55_v30 }
  0x2f   :  { %v23_v43 = vld [vmem:[%s437_s2 + $0x48] sm:$0xff] }
  0x30   :  { %129 = vst [vmem:[%s438_s3 + $0x28] sm:$0xff] %v107_v36  ;;  %v111_v56 = vadd.f32 %v89_v47, %v23_v43  ;;  %v78_v36 = vld [vmem:[%s436_s1 + $0xa0] sm:$0xff] }
  0x31   :  { %v100_v38 = vadd.f32 %v78_v36, %v56_v35 }
  0x37   :  { %v24_v48 = vld [vmem:[%s437_s2 + $0x50] sm:$0xff] }
  0x38   :  { %130 = vst [vmem:[%s438_s3 + $0x30] sm:$0xff] %v108_v41  ;;  %v112_v61 = vadd.f32 %v90_v52, %v24_v48  ;;  %v79_v41 = vld [vmem:[%s436_s1 + $0xa8] sm:$0xff] }
  0x39   :  { %v101_v43 = vadd.f32 %v79_v41, %v57_v40 }
  0x3f   :  { %v25_v53 = vld [vmem:[%s437_s2 + $0x58] sm:$0xff] }
  0x40   :  { %131 = vst [vmem:[%s438_s3 + $0x38] sm:$0xff] %v109_v46  ;;  %v113_v2 = vadd.f32 %v91_v57, %v25_v53 }
  0x47   :  { %v26_v58 = vld [vmem:[%s437_s2 + $0x60] sm:$0xff] }
  0x48   :  { %132 = vst [vmem:[%s438_s3 + $0x40] sm:$0xff] %v110_v51  ;;  %v114_v7 = vadd.f32 %v92_v62, %v26_v58 }
  0x4f   :  { %v27_v63 = vld [vmem:[%s437_s2 + $0x68] sm:$0xff] }
  0x50   :  { %133 = vst [vmem:[%s438_s3 + $0x48] sm:$0xff] %v111_v56  ;;  %v115_v12 = vadd.f32 %v93_v3, %v27_v63 }
  0x57   :  { %v28_v4 = vld [vmem:[%s437_s2 + $0x70] sm:$0xff] }
  0x58   :  { %134 = vst [vmem:[%s438_s3 + $0x50] sm:$0xff] %v112_v61  ;;  %v116_v17 = vadd.f32 %v94_v8, %v28_v4 }
  0x5f   :  { %v29_v9 = vld [vmem:[%s437_s2 + $0x78] sm:$0xff] }
  0x60   :  { %135 = vst [vmem:[%s438_s3 + $0x58] sm:$0xff] %v113_v2  ;;  %v117_v22 = vadd.f32 %v95_v13, %v29_v9 }
  0x67   :  { %v30_v14 = vld [vmem:[%s437_s2 + $0x80] sm:$0xff] }
  0x68   :  { %136 = vst [vmem:[%s438_s3 + $0x60] sm:$0xff] %v114_v7  ;;  %v118_v27 = vadd.f32 %v96_v18, %v30_v14 }
  0x6f   :  { %v31_v19 = vld [vmem:[%s437_s2 + $0x88] sm:$0xff] }
  0x70   :  { %137 = vst [vmem:[%s438_s3 + $0x68] sm:$0xff] %v115_v12  ;;  %v119_v32 = vadd.f32 %v97_v23, %v31_v19 }
  0x77   :  { %v32_v24 = vld [vmem:[%s437_s2 + $0x90] sm:$0xff] }
  0x78   :  { %138 = vst [vmem:[%s438_s3 + $0x70] sm:$0xff] %v116_v17  ;;  %v120_v37 = vadd.f32 %v98_v28, %v32_v24 }
  0x7f   :  { %v33_v29 = vld [vmem:[%s437_s2 + $0x98] sm:$0xff] }
  0x80   :  { %139 = vst [vmem:[%s438_s3 + $0x78] sm:$0xff] %v117_v22  ;;  %v121_v42 = vadd.f32 %v99_v33, %v33_v29 }
  0x87   :  { %v34_v34 = vld [vmem:[%s437_s2 + $0xa0] sm:$0xff] }
  0x88   :  { %140 = vst [vmem:[%s438_s3 + $0x80] sm:$0xff] %v118_v27  ;;  %v122_v44 = vadd.f32 %v100_v38, %v34_v34 }
  0x8f   :  { %v35_v39 = vld [vmem:[%s437_s2 + $0xa8] sm:$0xff] }
  0x90   :  { %141 = vst [vmem:[%s438_s3 + $0x88] sm:$0xff] %v119_v32  ;;  %142 = vst [vmem:[%s438_s3 + $0x90] sm:$0xff] %v120_v37  ;;  %v123_v45 = vadd.f32 %v101_v43, %v35_v39 }
  0x91   :  { %143 = vst [vmem:[%s438_s3 + $0x98] sm:$0xff] %v121_v42  ;;  %144 = vst [vmem:[%s438_s3 + $0xa0] sm:$0xff] %v122_v44 }
  0x92   :  { %146 = vst.msk [vmem:[%s438_s3 + $0xa8] sm:$0xff] %vm145_vm0, %v123_v45 }

</bundles_post_ra>
